<compile_context>
chip_gen: v5e
topology: v5e:2x2
jax: 0.10.0
libtpu: 0.0.40
codegen_flags: <defaults>
</compile_context>

<pallas_src>
import functools

import jax
import jax.numpy as jnp
from jax import lax
from jax.experimental import pallas as pl
from jax.experimental.pallas import tpu as pltpu

_LANE = 128
_CHUNK_ROWS = 256                 # in-kernel fold granularity (256x128 f32 = 32 vregs)
_TARGET_TILE_BYTES = 4 << 20      # ~4 MiB per pipelined input buffer
_NUM_CORES = 2                    # leading "parallel" grid axis (megacore split)


def _partial_sum_kernel(pred_ref, part_ref, *, tile_rows, chunk_rows,
                        total_rows, num_tiles, tiles_per_core,
                        needs_row_mask, needs_skip):
    """Streams (tile_rows, 128) tiles; accumulates per-core (1,128) partials."""
    c = pl.program_id(0)
    k = pl.program_id(1)
    tile_id = c * tiles_per_core + k

    @pl.when(k == 0)
    def _init():
        part_ref[...] = jnp.zeros_like(part_ref)

    nchunks = tile_rows // chunk_rows

    def accumulate(apply_mask):
        def fold_chunk(g, acc):
            if isinstance(g, int):
                start = g * chunk_rows
            else:
                start = pl.multiple_of(g * chunk_rows, chunk_rows)
            chunk = pred_ref[pl.ds(start, chunk_rows), :].astype(jnp.float32)
            if apply_mask:
                # Only the last real tile can hang past the end of the array;
                # stale VMEM rows are zeroed (select does not propagate NaN).
                rid = (tile_id * tile_rows + start
                       + lax.broadcasted_iota(jnp.int32, (chunk_rows, _LANE), 0))
                chunk = jnp.where(rid < total_rows, chunk, 0.0)
            # (chunk_rows,128) -> (1,128): VPU adds + one sublane reduce;
            # all intermediates stay in vregs.
            return acc + jnp.sum(chunk, axis=0, keepdims=True)

        zero = jnp.zeros((1, _LANE), jnp.float32)
        if nchunks == 1:
            part = fold_chunk(0, zero)
        else:
            part = lax.fori_loop(0, nchunks, fold_chunk, zero,
                                 unroll=min(8, nchunks))
        # Single one-vreg RMW of the resident output block per tile.
        part_ref[...] += part

    if not (needs_row_mask or needs_skip):
        accumulate(False)
    else:
        full_limit = num_tiles - 1 if needs_row_mask else num_tiles

        @pl.when(tile_id < full_limit)
        def _full():
            accumulate(False)

        if needs_row_mask:
            @pl.when(tile_id == num_tiles - 1)
            def _tail():
                accumulate(True)
        # tile_id >= num_tiles: duplicate (clamped) tile -> contributes nothing.


def wgan_loss(predicted, true):
    """Pallas implementation of WGANLoss.forward(predicted, true)."""
    n_elems = int(predicted.size)
    out_dtype = jnp.result_type(predicted.dtype, true.dtype)
    true_f32 = true.astype(jnp.float32)

    if n_elems == 0:
        # torch.mean of an empty tensor is NaN.
        return jnp.full(true.shape, jnp.nan, dtype=out_dtype)

    itemsize = predicted.dtype.itemsize
    flat = predicted.reshape(-1)                 # free (contiguous)
    n_main = (n_elems // _LANE) * _LANE
    rows = n_main // _LANE

    tail_sum = None
    if n_main != n_elems:
        # <128-element remainder: summed in plain XLA (tiny read), no jnp.pad
        # (which would write a full-size zero-padded copy of `predicted`).
        tail_sum = jnp.sum(flat[n_main:].astype(jnp.float32))

    if rows == 0:
        total = tail_sum
    else:
        if n_main != n_elems:
            # Prefix slice per the review (kernel consumes the first rows*128
            # elements).  No pad write / zero fill; exact multiples of 128
            # (the common case) take the copy-free reshape below.
            main = flat[:n_main]
        else:
            main = flat
        pred2d = main.reshape(rows, _LANE)       # free (contiguous)

        # ---- tile sizing: by bytes, rounded to the in-kernel chunk size ----
        target_rows = max(_CHUNK_ROWS,
                          (_TARGET_TILE_BYTES // (_LANE * itemsize))
                          // _CHUNK_ROWS * _CHUNK_ROWS)
        if rows < _CHUNK_ROWS:
            tile_rows = rows                     # single full-extent tile
            chunk_rows = rows
        else:
            tile_rows = min(target_rows, (rows // _CHUNK_ROWS) * _CHUNK_ROWS)
            chunk_rows = _CHUNK_ROWS
        num_tiles = pl.cdiv(rows, tile_rows)
        num_cores = _NUM_CORES if num_tiles >= _NUM_CORES else 1
        tiles_per_core = pl.cdiv(num_tiles, num_cores)
        needs_row_mask = (rows % tile_rows) != 0
        needs_skip = (num_cores * tiles_per_core) != num_tiles

        def pred_index_map(c, k):
            # Clamp so the (at most one) padding grid step re-reads the last
            # real tile instead of indexing out of bounds; its contribution
            # is skipped inside the kernel.
            return (jnp.minimum(c * tiles_per_core + k, num_tiles - 1), 0)

        tile_bytes = tile_rows * _LANE * itemsize
        vmem_limit = int(min(max(3 * tile_bytes + (4 << 20), 8 << 20), 28 << 20))

        partials = pl.pallas_call(
            functools.partial(
                _partial_sum_kernel,
                tile_rows=tile_rows,
                chunk_rows=chunk_rows,
                total_rows=rows,
                num_tiles=num_tiles,
                tiles_per_core=tiles_per_core,
                needs_row_mask=needs_row_mask,
                needs_skip=needs_skip,
            ),
            out_shape=jax.ShapeDtypeStruct((num_cores, 1, _LANE), jnp.float32),
            grid=(num_cores, tiles_per_core),
            in_specs=[pl.BlockSpec((tile_rows, _LANE), pred_index_map)],
            out_specs=pl.BlockSpec((None, 1, _LANE), lambda c, k: (c, 0, 0)),
            compiler_params=pltpu.CompilerParams(
                dimension_semantics=("parallel", "arbitrary"),
                vmem_limit_bytes=vmem_limit,
            ),
            cost_estimate=pl.CostEstimate(
                flops=n_main,
                transcendentals=0,
                bytes_accessed=n_main * itemsize + num_cores * _LANE * 4,
            ),
        )(pred2d)

        total = jnp.sum(partials)
        if tail_sum is not None:
            total = total + tail_sum

    # Tiny epilogue in plain XLA (fused): mean + (-2*true+1)*mean.
    mean = total / jnp.float32(n_elems)
    out = (-2.0 * true_f32 + 1.0) * mean
    return out.astype(out_dtype)


if __name__ == "__main__":
    key = jax.random.PRNGKey(0)
    kp, kt = jax.random.split(key)

    # "predicted" = discriminator scores, NCHW like a conv output.
    predicted = jax.random.normal(kp, (2, 4, 16, 16), dtype=jnp.float32)
    # "true" = real/fake labels per example (0 or 1).
    true = jax.random.bernoulli(kt, 0.5, (2,)).astype(jnp.float32)

    out = wgan_loss(predicted, true)
    out = jax.block_until_ready(out)

    # Reference check against plain-JAX semantics of the PyTorch module.
    ref = (-2.0 * true + 1.0) * jnp.mean(predicted)
    assert out.shape == true.shape
    assert jnp.allclose(out, ref, atol=1e-5, rtol=1e-5), (out, ref)

    print("KERNEL_OK")
</pallas_src>

<mosaic_0001>
module attributes {stable_mosaic.version = 11 : i64} {
  func.func @_partial_sum_kernel(%arg0: i32, %arg1: i32, %arg2: memref<16x128xf32, #tpu.memory_space<vmem>>, %arg3: memref<1x1x128xf32, #tpu.memory_space<vmem>>) attributes {dimension_semantics = [#tpu.dimension_semantics<parallel>, #tpu.dimension_semantics<arbitrary>], iteration_bounds = array<i64: 1, 1>, scalar_prefetch = 0 : i64, scratch_operands = 0 : i64, tpu.core_type = #tpu.core_type<tc>, window_params = [{transform_indices = @transform_0, window_bounds = array<i64: 16, 128>}, {transform_indices = @transform_1, window_bounds = array<i64: 1, 1, 128>}]} {
    %c0_i32 = arith.constant 0 : i32
    %0 = arith.cmpi eq, %arg1, %c0_i32 : i32
    %1 = arith.extui %0 : i1 to i32
    %c0_i32_0 = arith.constant 0 : i32
    %2 = arith.cmpi ne, %1, %c0_i32_0 : i32
    scf.if %2 {
      %cst_9 = arith.constant 0.000000e+00 : f32
      %14 = vector.broadcast %cst_9 : f32 to vector<1x128xf32>
      %c0_10 = arith.constant 0 : index
      %c0_11 = arith.constant 0 : index
      %c0_12 = arith.constant 0 : index
      %15 = vector.load %arg3[%c0_10, %c0_11, %c0_12] : memref<1x1x128xf32, #tpu.memory_space<vmem>>, vector<1x1x128xf32>
      %16 = vector.shape_cast %15 : vector<1x1x128xf32> to vector<1x128xf32>
      %17 = vector.shape_cast %14 : vector<1x128xf32> to vector<1x1x128xf32>
      tpu.vector_store %arg3[%c0_10, %c0_11, %c0_12], %17 {strides = array<i32>} : memref<1x1x128xf32, #tpu.memory_space<vmem>>, vector<1x1x128xf32>,
    } else {
    }
    %cst = arith.constant 0.000000e+00 : f32
    %3 = vector.broadcast %cst : f32 to vector<1x128xf32>
    %c0 = arith.constant 0 : index
    %c0_1 = arith.constant 0 : index
    %4 = vector.load %arg2[%c0, %c0_1] : memref<16x128xf32, #tpu.memory_space<vmem>>, vector<16x128xf32>
    %cst_2 = arith.constant dense<0.000000e+00> : vector<128xf32>
    %5 = vector.multi_reduction <add>, %4, %cst_2 [0] : vector<16x128xf32> to vector<128xf32>
    %6 = vector.shape_cast %5 : vector<128xf32> to vector<1x128xf32>
    %7 = arith.addf %3, %6 : vector<1x128xf32>
    %c0_3 = arith.constant 0 : index
    %c0_4 = arith.constant 0 : index
    %c0_5 = arith.constant 0 : index
    %8 = vector.load %arg3[%c0_3, %c0_4, %c0_5] : memref<1x1x128xf32, #tpu.memory_space<vmem>>, vector<1x1x128xf32>
    %9 = vector.shape_cast %8 : vector<1x1x128xf32> to vector<1x128xf32>
    %10 = arith.addf %9, %7 : vector<1x128xf32>
    %c0_6 = arith.constant 0 : index
    %c0_7 = arith.constant 0 : index
    %c0_8 = arith.constant 0 : index
    %11 = vector.load %arg3[%c0_6, %c0_7, %c0_8] : memref<1x1x128xf32, #tpu.memory_space<vmem>>, vector<1x1x128xf32>
    %12 = vector.shape_cast %11 : vector<1x1x128xf32> to vector<1x128xf32>
    %13 = vector.shape_cast %10 : vector<1x128xf32> to vector<1x1x128xf32>
    tpu.vector_store %arg3[%c0_6, %c0_7, %c0_8], %13 {strides = array<i32>} : memref<1x1x128xf32, #tpu.memory_space<vmem>>, vector<1x1x128xf32>,
    return
  }
  func.func @transform_0(%arg0: i32, %arg1: i32) -> (i32, i32) {
    %c1_i32 = arith.constant 1 : i32
    %0 = arith.muli %arg0, %c1_i32 : i32
    %1 = arith.addi %0, %arg1 : i32
    %c0_i32 = arith.constant 0 : i32
    %2 = arith.minsi %1, %c0_i32 : i32
    %c0_i32_0 = arith.constant 0 : i32
    %c0_i32_1 = arith.constant 0 : i32
    return %2, %c0_i32_0 : i32, i32
  }
  func.func @transform_1(%arg0: i32, %arg1: i32) -> (i32, i32, i32) {
    %c0_i32 = arith.constant 0 : i32
    %c0_i32_0 = arith.constant 0 : i32
    %c0_i32_1 = arith.constant 0 : i32
    return %arg0, %c0_i32, %c0_i32_0 : i32, i32, i32
  }
}

</mosaic_0001>

<bundles_post_ra>
// kernel: tpu_custom_call.1
= control target key start
LH: loop header
LB: loop body
LE: loop exit
PB: predicated region body
PF: predicated region fallthrough
CT: control target
= control target key end

     0   :  { %6 = vsyncpa [#allocation3], 0  ;;  %s150_s0 = inlined_call_operand.hbm [shape: f32[16,128], index: 0, kind: input, shape index: {}]   ;;  %s151_s1 = inlined_call_operand.hbm [shape: f32[1,1,128], index: 1, kind: output, shape index: {}]  }
   0x1   :  { %7 = vsyncpa [#allocation4], 0  ;;  %s18_s8 = sshll.u32 %s150_s0, 4  ;;  %s129_s9 = smov [#allocation2]   ;;  %s19_s8 = int_to_ptr.hbm [resolvable:$true] %s18_s8 }
   0x2   :  { %s20_s10 = sshll.u32 %s129_s9, 4  ;;  %s130_s11 = smov 128   ;;  %s21_s10 = int_to_ptr.vmem [resolvable:$true] %s20_s10 }
   0x3   :  { %s131_s12 = smov 8  }
   0x4   :  { %26 = dma.hbm_to_vmem [thread:$0]  %s19_s8, 256, %s21_s10, [#allocation3], %s130_s11, %s130_s11, %s131_s12  }
   0x5   :  { %125 = dma.done.wait [#allocation3], 256  }
   0x6   :  { %126 = vsyncadd [#allocation3], 4294967040  ;;  %v132_v0 = vmov 0.0   ;;  %v40_v1 = vld [vmem:[#allocation2] sm:$0xff]  ;;  %v41_v2 = vld [vmem:[#allocation2 + $0x8] sm:$0xff]  ;;  %s133_s0 = smov [#allocation5]  }
   0x7   :  { %39 = vst [vmem:[#allocation5] sm:$0x1] %v132_v0  ;;  %v42_v3 = vadd.f32 %v41_v2, %v40_v1  ;;  %s58_s13 = sshll.u32 %s133_s0, 4  ;;  %s60_s16 = sshll.u32 %s151_s1, 4  ;;  %s59_s13 = int_to_ptr.vmem [resolvable:$true] %s58_s13  ;;  %s61_s16 = int_to_ptr.hbm [resolvable:$true] %s60_s16 }
   0x9   :  { %v43_v4 = vrot.slane %v42_v3, 4 }
   0xb   :  { %v44_v5 = vadd.f32 %v43_v4, %v42_v3 }
   0xd   :  { %v45_v6 = vrot.slane %v44_v5, 2 }
   0xe   :  { %v50_v9 = vld [vmem:[#allocation5] sm:$0x1] }
   0xf   :  { %v46_v7 = vadd.f32 %v45_v6, %v44_v5 }
  0x11   :  { %v47_v8 = vrot.slane %v46_v7, 1 }
  0x13   :  { %v48_v10 = vadd.f32 %v47_v8, %v46_v7 }
  0x15   :  { %v51_v11 = vadd.f32 %v50_v9, %v48_v10 }
  0x17   :  { %52 = vst [vmem:[#allocation5] sm:$0x1] %v51_v11 }
  0x18   :  { %63 = dma.vmem_to_hbm [thread:$0]  %s59_s13, 16, %s61_s16, [#allocation4]  }
  0x19   :  { %127 = dma.done.wait [#allocation4], 16  }
  0x1a   :  { %128 = vsyncadd [#allocation4], 4294967280 }
  0x1b   :  { %68 = vsyncpa [#allocation3], 1 }
  0x1c   :  { %69 = vsyncpa [#allocation4], 1 }

</bundles_post_ra>
